<compile_context>
chip_gen: v7x
topology: tpu7x:2x2x1
jax: 0.10.0
libtpu: 0.0.40
codegen_flags: <defaults>
</compile_context>

<pallas_src>
import jax
import jax.numpy as jnp
from jax.experimental import pallas as pl
from jax.experimental.pallas import tpu as pltpu


_HIDDEN = 40
_N_CONST_COLS = 48   # 40 (w2) + 2 (w1) + 1 (b1) + 1 (b2) + 1 (w3) + 1 (b3) + pad


def _af(x):
    """af(x) = 1 / (1 + x**2).

    The approximate reciprocal executes on the EUP (its own VLIW slot, idle
    here); one Newton refinement r <- r*(2 - d*r) squares its ~2^-12 relative
    error down to ~1e-7, comfortably inside the 1e-5 accuracy budget.
    """
    d = 1.0 + x * x
    r = pl.reciprocal(d, approx=True)
    return r * (2.0 - d * r)


def _af_exact(x):
    return 1.0 / (1.0 + x * x)


def mlp_kernel(x_ref, c_ref, o_ref):
    c = c_ref[...]                          # (40, 48) packed grid-constant operands
    w2 = c[:, 0:_HIDDEN]                    # (40, 40)
    w1a = c[:, 40:41]                       # (40, 1)  fc1 weight, input feature 0
    w1b = c[:, 41:42]                       # (40, 1)  fc1 weight, input feature 1
    b1 = c[:, 42:43]                        # (40, 1)
    b2 = c[:, 43:44]                        # (40, 1)
    w3 = c[:, 44:45]                        # (40, 1)  fc3 weight (transposed)
    b3 = c[0:1, 45:46]                      # (1, 1)

    x = x_ref[...]                          # (2, TB)  batch on lanes

    # fc1 (K=2): two broadcast FMAs on the VPU (a K=2 MXU push is not worth it).
    h1 = _af(w1a * x[0:1, :] + w1b * x[1:2, :] + b1)            # (40, TB)

    # fc2 (40x40): the only MXU matmul, N = TB (lane-dense).  Precision pinned
    # so the f32 accumulation never degrades to a single bf16 pass.
    h2 = jnp.dot(w2, h1,
                 preferred_element_type=jnp.float32,
                 precision=jax.lax.Precision.HIGHEST)
    h2 = _af(h2 + b2)                                           # (40, TB)

    # fc3 (out=1): elementwise multiply + 40-wide feature reduction (XLU).
    y = jnp.sum(w3 * h2, axis=0, keepdims=True) + b3            # (1, TB)
    o_ref[...] = y.astype(o_ref.dtype)                          # lane-dense store


def _round_up(n, m):
    return ((n + m - 1) // m) * m


def _pack_constants(params):
    """Pack all weights/biases into one (40, 48) f32 array (one DMA stream)."""
    w1 = jnp.asarray(params["w1"], jnp.float32)        # (40, 2)
    b1 = jnp.asarray(params["b1"], jnp.float32)        # (40,)
    w2 = jnp.asarray(params["w2"], jnp.float32)        # (40, 40)
    b2 = jnp.asarray(params["b2"], jnp.float32)        # (40,)
    w3 = jnp.asarray(params["w3"], jnp.float32)        # (1, 40)
    b3 = jnp.asarray(params["b3"], jnp.float32)        # (1,)
    c = jnp.zeros((_HIDDEN, _N_CONST_COLS), jnp.float32)
    c = c.at[:, 0:_HIDDEN].set(w2)
    c = c.at[:, 40:42].set(w1)
    c = c.at[:, 42].set(b1)
    c = c.at[:, 43].set(b2)
    c = c.at[:, 44].set(w3[0, :])
    c = c.at[0, 45].set(b3[0])
    return c


def _choose_tile(batch, max_tile, min_grid):
    """Pick a lane-dense batch tile (multiple of 128) and the padded batch.

    Keeps grid >= min_grid when there is enough work so the 'parallel' batch
    axis can shard across both TensorCores on v7x.
    """
    max_tile = max(128, _round_up(max_tile, 128))       # guard: 128-multiple cap
    padded128 = _round_up(batch, 128)
    n_steps = pl.cdiv(padded128, max_tile)
    if padded128 >= 128 * min_grid:                      # enough work to split
        n_steps = max(n_steps, min_grid)
    tb = min(max_tile, _round_up(pl.cdiv(padded128, n_steps), 128))
    padded = _round_up(batch, tb)
    return tb, padded


def net_forward(x, params, *, max_tile=8192, min_grid=2, feature_major=False,
                vmem_limit_bytes=None):
    """Forward pass of `Net`.

    x: (B, 2) float32 (PyTorch layout).  Callers that already hold the data
    feature-major as (2, B) can pass feature_major=True to skip the wrapper
    transpose (one whole HBM pass over x).  Returns (B, 1).
    """
    if feature_major:
        x_t = jnp.asarray(x, jnp.float32)            # (2, B) already feature-major
        B = x_t.shape[1]
    else:
        x2 = jnp.asarray(x, jnp.float32)             # (B, 2) PyTorch layout
        B = x2.shape[0]
        x_t = x2.T                                   # single layout pass over x

    TB, padded_B = _choose_tile(B, max_tile, min_grid)
    grid = (padded_B // TB,)

    if padded_B != B:                                # pad only when actually needed
        x_t = jnp.pad(x_t, ((0, 0), (0, padded_B - B)))

    consts = _pack_constants(params)

    out_t = pl.pallas_call(
        mlp_kernel,
        out_shape=jax.ShapeDtypeStruct((1, padded_B), jnp.float32),
        grid=grid,
        in_specs=[
            pl.BlockSpec((2, TB), lambda i: (0, i)),                   # x tile
            pl.BlockSpec((_HIDDEN, _N_CONST_COLS), lambda i: (0, 0)),  # resident consts
        ],
        out_specs=pl.BlockSpec((1, TB), lambda i: (0, i)),
        compiler_params=pltpu.CompilerParams(
            dimension_semantics=("parallel",),
            vmem_limit_bytes=vmem_limit_bytes),      # raise explicitly for TB >~ 32K
    )(x_t, consts)

    return out_t[0, :B].reshape(B, 1)


def init_params(key):
    """Deterministic init mimicking nn.Linear: weight (out, in), bias (out,),
    both U(-1/sqrt(fan_in), 1/sqrt(fan_in))."""
    keys = jax.random.split(key, 6)

    def linear(kw, kb, fan_in, fan_out):
        bound = 1.0 / jnp.sqrt(jnp.float32(fan_in))
        w = jax.random.uniform(kw, (fan_out, fan_in), jnp.float32, -bound, bound)
        b = jax.random.uniform(kb, (fan_out,), jnp.float32, -bound, bound)
        return w, b

    w1, b1 = linear(keys[0], keys[1], 2, 40)
    w2, b2 = linear(keys[2], keys[3], 40, 40)
    w3, b3 = linear(keys[4], keys[5], 40, 1)
    return {"w1": w1, "b1": b1, "w2": w2, "b2": b2, "w3": w3, "b3": b3}


def net_forward_ref(x, p):
    """Pure-JAX reference (PyTorch semantics: y = x @ W.T + b), full f32."""
    hp = jax.lax.Precision.HIGHEST
    h = _af_exact(jnp.dot(x, p["w1"].T, precision=hp) + p["b1"])
    h = _af_exact(jnp.dot(h, p["w2"].T, precision=hp) + p["b2"])
    return jnp.dot(h, p["w3"].T, precision=hp) + p["b3"]


if __name__ == "__main__":
    key = jax.random.PRNGKey(0)
    k_x, k_x2, k_p = jax.random.split(key, 3)
    params = init_params(k_p)

    # Small batch (pads up to one 128-wide lane tile, grid=1).
    B = 8
    x = jax.random.normal(k_x, (B, 2), dtype=jnp.float32)
    out = jax.block_until_ready(net_forward(x, params))
    ref = net_forward_ref(x, params)
    assert out.shape == (B, 1), out.shape
    assert jnp.allclose(out, ref, atol=1e-5, rtol=1e-5)

    # Feature-major fast path: caller supplies (2, B), no wrapper transpose.
    out_fm = jax.block_until_ready(net_forward(x.T, params, feature_major=True))
    assert out_fm.shape == (B, 1), out_fm.shape
    assert jnp.allclose(out_fm, ref, atol=1e-5, rtol=1e-5)

    # Non-tile-multiple batch: multi-step grid (TB=256, grid=2 -> both
    # TensorCores on v7x) plus zero-padded tail.
    B2 = 300
    x2 = jax.random.normal(k_x2, (B2, 2), dtype=jnp.float32)
    out2 = jax.block_until_ready(net_forward(x2, params))
    ref2 = net_forward_ref(x2, params)
    assert out2.shape == (B2, 1), out2.shape
    assert jnp.allclose(out2, ref2, atol=1e-5, rtol=1e-5)

    print("KERNEL_OK")
</pallas_src>

<mosaic_0001>
module attributes {stable_mosaic.version = 11 : i64} {
  func.func @mlp_kernel(%arg0: i32, %arg1: memref<2x128xf32, #tpu.memory_space<vmem>>, %arg2: memref<40x48xf32, #tpu.memory_space<vmem>>, %arg3: memref<1x128xf32, #tpu.memory_space<vmem>>) attributes {dimension_semantics = [#tpu.dimension_semantics<parallel>], iteration_bounds = array<i64: 1>, scalar_prefetch = 0 : i64, scratch_operands = 0 : i64, tpu.core_type = #tpu.core_type<tc>, window_params = [{transform_indices = @transform_0, window_bounds = array<i64: 2, 128>}, {pipeline_mode = #tpu.pipeline_mode<synchronous>, transform_indices = @transform_1, window_bounds = array<i64: 40, 48>}, {transform_indices = @transform_2, window_bounds = array<i64: 1, 128>}]} {
    %c0 = arith.constant 0 : index
    %c0_0 = arith.constant 0 : index
    %0 = vector.load %arg2[%c0, %c0_0] : memref<40x48xf32, #tpu.memory_space<vmem>>, vector<40x48xf32>
    %1 = vector.extract_strided_slice %0 {offsets = [0, 0], sizes = [40, 40], strides = [1, 1]} : vector<40x48xf32> to vector<40x40xf32>
    %2 = vector.extract_strided_slice %0 {offsets = [0, 40], sizes = [40, 1], strides = [1, 1]} : vector<40x48xf32> to vector<40x1xf32>
    %3 = vector.extract_strided_slice %0 {offsets = [0, 41], sizes = [40, 1], strides = [1, 1]} : vector<40x48xf32> to vector<40x1xf32>
    %4 = vector.extract_strided_slice %0 {offsets = [0, 42], sizes = [40, 1], strides = [1, 1]} : vector<40x48xf32> to vector<40x1xf32>
    %5 = vector.extract_strided_slice %0 {offsets = [0, 43], sizes = [40, 1], strides = [1, 1]} : vector<40x48xf32> to vector<40x1xf32>
    %6 = vector.extract_strided_slice %0 {offsets = [0, 44], sizes = [40, 1], strides = [1, 1]} : vector<40x48xf32> to vector<40x1xf32>
    %7 = vector.extract_strided_slice %0 {offsets = [0, 45], sizes = [1, 1], strides = [1, 1]} : vector<40x48xf32> to vector<1x1xf32>
    %c0_1 = arith.constant 0 : index
    %c0_2 = arith.constant 0 : index
    %8 = vector.load %arg1[%c0_1, %c0_2] : memref<2x128xf32, #tpu.memory_space<vmem>>, vector<2x128xf32>
    %9 = vector.extract_strided_slice %8 {offsets = [0, 0], sizes = [1, 128], strides = [1, 1]} : vector<2x128xf32> to vector<1x128xf32>
    %10 = vector.broadcast %2 : vector<40x1xf32> to vector<40x128xf32>
    %11 = vector.broadcast %9 : vector<1x128xf32> to vector<40x128xf32>
    %12 = arith.mulf %10, %11 : vector<40x128xf32>
    %13 = vector.extract_strided_slice %8 {offsets = [1, 0], sizes = [1, 128], strides = [1, 1]} : vector<2x128xf32> to vector<1x128xf32>
    %14 = vector.broadcast %3 : vector<40x1xf32> to vector<40x128xf32>
    %15 = vector.broadcast %13 : vector<1x128xf32> to vector<40x128xf32>
    %16 = arith.mulf %14, %15 : vector<40x128xf32>
    %17 = arith.addf %12, %16 : vector<40x128xf32>
    %18 = vector.broadcast %4 : vector<40x1xf32> to vector<40x128xf32>
    %19 = arith.addf %17, %18 : vector<40x128xf32>
    %20 = arith.mulf %19, %19 : vector<40x128xf32>
    %cst = arith.constant 1.000000e+00 : f32
    %21 = vector.broadcast %cst : f32 to vector<40x128xf32>
    %22 = arith.addf %21, %20 : vector<40x128xf32>
    %23 = tpu.reciprocal %22 {approx = true} : vector<40x128xf32> -> vector<40x128xf32>
    %24 = arith.mulf %22, %23 : vector<40x128xf32>
    %cst_3 = arith.constant 2.000000e+00 : f32
    %25 = vector.broadcast %cst_3 : f32 to vector<40x128xf32>
    %26 = arith.subf %25, %24 : vector<40x128xf32>
    %27 = arith.mulf %23, %26 : vector<40x128xf32>
    %cst_4 = arith.constant dense<0.000000e+00> : vector<40x128xf32>
    %28 = tpu.matmul %1, %27, %cst_4 {dimension_numbers = #tpu.dot_dimension_numbers<[1], [0], [0], [1], [0, 0, 1, 1], [], []>, precision = #tpu.contract_precision<fp32>} : vector<40x40xf32>, vector<40x128xf32>, vector<40x128xf32> -> vector<40x128xf32>
    %29 = vector.broadcast %5 : vector<40x1xf32> to vector<40x128xf32>
    %30 = arith.addf %28, %29 : vector<40x128xf32>
    %31 = arith.mulf %30, %30 : vector<40x128xf32>
    %cst_5 = arith.constant 1.000000e+00 : f32
    %32 = vector.broadcast %cst_5 : f32 to vector<40x128xf32>
    %33 = arith.addf %32, %31 : vector<40x128xf32>
    %34 = tpu.reciprocal %33 {approx = true} : vector<40x128xf32> -> vector<40x128xf32>
    %35 = arith.mulf %33, %34 : vector<40x128xf32>
    %cst_6 = arith.constant 2.000000e+00 : f32
    %36 = vector.broadcast %cst_6 : f32 to vector<40x128xf32>
    %37 = arith.subf %36, %35 : vector<40x128xf32>
    %38 = arith.mulf %34, %37 : vector<40x128xf32>
    %39 = vector.broadcast %6 : vector<40x1xf32> to vector<40x128xf32>
    %40 = arith.mulf %39, %38 : vector<40x128xf32>
    %cst_7 = arith.constant dense<0.000000e+00> : vector<128xf32>
    %41 = vector.multi_reduction <add>, %40, %cst_7 [0] : vector<40x128xf32> to vector<128xf32>
    %42 = vector.shape_cast %41 : vector<128xf32> to vector<1x128xf32>
    %43 = vector.broadcast %7 : vector<1x1xf32> to vector<1x128xf32>
    %44 = arith.addf %42, %43 : vector<1x128xf32>
    %c0_8 = arith.constant 0 : index
    %c0_9 = arith.constant 0 : index
    %45 = vector.load %arg3[%c0_8, %c0_9] : memref<1x128xf32, #tpu.memory_space<vmem>>, vector<1x128xf32>
    tpu.vector_store %arg3[%c0_8, %c0_9], %44 {strides = array<i32>} : memref<1x128xf32, #tpu.memory_space<vmem>>, vector<1x128xf32>,
    return
  }
  func.func @transform_0(%arg0: i32) -> (i32, i32) {
    %c0_i32 = arith.constant 0 : i32
    %c0_i32_0 = arith.constant 0 : i32
    return %c0_i32, %arg0 : i32, i32
  }
  func.func @transform_1(%arg0: i32) -> (i32, i32) {
    %c0_i32 = arith.constant 0 : i32
    %c0_i32_0 = arith.constant 0 : i32
    %c0_i32_1 = arith.constant 0 : i32
    return %c0_i32, %c0_i32_0 : i32, i32
  }
  func.func @transform_2(%arg0: i32) -> (i32, i32) {
    %c0_i32 = arith.constant 0 : i32
    %c0_i32_0 = arith.constant 0 : i32
    return %c0_i32, %arg0 : i32, i32
  }
}

</mosaic_0001>

<bundles_post_ra>
// kernel: tpu_custom_call.1
= control target key start
LH: loop header
LB: loop body
LE: loop exit
PB: predicated region body
PF: predicated region fallthrough
CT: control target
= control target key end

     0   :  { %7 = vsyncpa [#allocation3], 0  ;;  %s1664_s0 = inlined_call_operand.hbm [shape: f32[2,128], index: 0, kind: input, shape index: {}]   ;;  %s1665_s1 = inlined_call_operand.hbm [shape: f32[40,48], index: 1, kind: input, shape index: {}]   ;;  %s1666_s2 = inlined_call_operand.hbm [shape: f32[1,128], index: 2, kind: output, shape index: {}]  }
   0x1   :  { %8 = vsyncpa [#allocation6], 0 }
   0x2   :  { %9 = vsyncpa [#allocation4], 0  ;;  %s1372_s9 = smov [#allocation2]   ;;  %s1373_s11 = smov [#allocation5]  }
   0x3   :  { %s16_s10 = sshll.u32 %s1372_s9, 4  ;;  %s25_s12 = sshll.u32 %s1373_s11, 4  ;;  %s17_s10 = int_to_ptr.vmem [resolvable:$true] %s16_s10  ;;  %s1401_s12 = int_to_ptr.vmem [resolvable:$true] %s25_s12 }
   0x4   :  { %s1300_s15 = scalar_lea.hbm %s1664_s0, 32 }
   0x5   :  { %p1301_p0 = scmp.ne.s32.totalorder %s1664_s0, %s1300_s15  ;;  %p1304_p1 = scmp.lt.u32.totalorder %s1300_s15, %s1664_s0 }
   0x7   :  { %p1306_p2 = pnand %p1304_p1, %p1301_p0 }
   0x9   :  { %1309 = shalt.err (!%p1306_p2)
}
   0xa   :  { %s1310_s20 = scalar_lea.vmem %s17_s10, 32  ;;  %p1315_p4 = scmp.lt.s32.totalorder %s17_s10, %s17_s10 }
   0xb   :  { %p1311_p3 = scmp.ne.s32.totalorder %s17_s10, %s1310_s20  ;;  %p1316_p5 = scmp.lt.s32.totalorder %s1310_s20, %s1310_s20 }
   0xd   :  { %p1317_p6 = por %p1316_p5, %p1315_p4 }
   0xf   :  { %p1318_p7 = pnand %p1317_p6, %p1311_p3 }
  0x11   :  { %1321 = shalt.err (!%p1318_p7)
}
  0x12   :  { %19 = dma.hbm_to_vmem [thread:$0]  %s1664_s0, 32, %s17_s10, [#allocation3]  }
  0x13   :  { %s1322_s25 = scalar_lea.hbm %s1665_s1, 640 }
  0x14   :  { %p1323_p8 = scmp.ne.s32.totalorder %s1665_s1, %s1322_s25  ;;  %p1326_p9 = scmp.lt.u32.totalorder %s1322_s25, %s1665_s1 }
  0x16   :  { %p1328_p10 = pnand %p1326_p9, %p1323_p8 }
  0x18   :  { %1331 = shalt.err (!%p1328_p10)
}
  0x19   :  { %s1332_s30 = scalar_lea.vmem %s1401_s12, 640  ;;  %p1337_p12 = scmp.lt.s32.totalorder %s1401_s12, %s1401_s12 }
  0x1a   :  { %p1333_p11 = scmp.ne.s32.totalorder %s1401_s12, %s1332_s30  ;;  %p1338_p13 = scmp.lt.s32.totalorder %s1332_s30, %s1332_s30 }
  0x1c   :  { %p1339_p0 = por %p1338_p13, %p1337_p12 }
  0x1e   :  { %p1340_p1 = pnand %p1339_p0, %p1333_p11 }
  0x20   :  { %1343 = shalt.err (!%p1340_p1)
}
  0x21   :  { %s1374_s0 = smov 128   ;;  %s1375_s3 = smov 8  }
  0x22   :  { %31 = dma.hbm_to_vmem [thread:$0]  %s1665_s1, 640, %s1401_s12, [#allocation6], %s1374_s0, %s1374_s0, %s1375_s3  }
  0x23   :  { %1366 = dma.done.wait [#allocation3], 32  }
  0x24   :  { %1367 = vsyncadd [#allocation3], 4294967264 }
  0x25   :  { %1368 = dma.done.wait [#allocation6], 640  }
  0x26   :  { %1369 = vsyncadd [#allocation6], 4294966656  ;;  %v1376_v0 = vmov 41   ;;  %v1377_v1 = vmov 40   ;;  %v1432_v2 = vld [vmem:[#allocation5] sm:$0xff]  ;;  %v1436_v3 = vld [vmem:[#allocation5 + $0x8] sm:$0xff]  ;;  %v69_v11 = vlaneseq }
  0x27   :  { %1266 = vset.pattern.permute.xlu1 %v1376_v0  ;;  %1265 = vset.pattern.permute.xlu0 %v1377_v1  ;;  %v1440_v4 = vld [vmem:[#allocation5 + $0x10] sm:$0xff]  ;;  %v1442_v5 = vld [vmem:[#allocation5 + $0x18] sm:$0xff]  ;;  %v1378_v6 = vmov 42   ;;  %v1450_v7 = vld [vmem:[#allocation5 + $0x20] sm:$0xff]  ;;  %v1379_v8 = vmov 0.0|0.0   ;;  %vm1380_vm0 = vmmov 0  }
  0x28   :  { %79 = vperm.xlu1 %1266, %v1432_v2   ;;  %46 = vperm.xlu0 %1265, %v1432_v2   ;;  %v1381_v9 = vmov 0.0   ;;  %v1382_v10 = vmov 43   ;;  %v70_v14 = vshrl.u32 %v69_v11, 7  ;;  %v1383_v15 = vmov 44   ;;  %v43_v20 = vld [vmem:[#allocation2] sm:$0x3] }
  0x29   :  { %1165 = vmatprep.subr.bf16.mxu1 %v1379_v8  ;;  %1183 = vmatprep.subr.bf16.mxu0 %v1379_v8  ;;  %v1384_v25 = vmov 45   ;;  %vm187_vm1 = vcmask 326656   ;;  %s1385_s1 = smov [#allocation7]  }
  0x2a   :  { %1025 = vmatprep.mubr.msk.f32.mxu1 %vm1380_vm0, %v1381_v9  ;;  %1100 = vmatprep.mubr.msk.f32.mxu0 %vm1380_vm0, %v1381_v9  ;;  %v100_v18 = vsub.s32 1, %v70_v14  ;;  %v71_v19 = vsub.s32 0, %v70_v14  ;;  %s945_s6 = sshll.u32 %s1385_s1, 4  ;;  %s946_s6 = int_to_ptr.vmem [resolvable:$true] %s945_s6 }
  0x2b   :  { %s1344_s7 = scalar_lea.vmem %s946_s6, 16  ;;  %s1348_s8 = scalar_lea.vmem %s946_s6, 32 }
  0x2c   :  { %83 = vperm.xlu1 %1266, %v1436_v3   ;;  %51 = vperm.xlu0 %1265, %v1436_v3   ;;  %v101_v23 = vrot.slane %v43_v20, %v100_v18  ;;  %v72_v24 = vrot.slane %v43_v20, %v71_v19  ;;  %p1345_p2 = scmp.ne.s32.totalorder %s946_s6, %s1344_s7  ;;  %p1349_p3 = scmp.lt.s32.totalorder %s946_s6, %s946_s6 }
  0x2d   :  { %p1350_p4 = scmp.lt.s32.totalorder %s1348_s8, %s1344_s7 }
  0x2f   :  { %p1351_p5 = por %p1350_p4, %p1349_p3 }
  0x30   :  { %1267 = vset.pattern.permute.xlu1 %v1377_v1  ;;  %56 = vperm.xlu0 %1265, %v1440_v4  }
  0x31   :  { %61 = vperm.xlu1 %1267, %v1442_v5   ;;  %p1352_p6 = pnand %p1351_p5, %p1345_p2 }
  0x34   :  { %1268 = vset.pattern.permute.xlu0 %v1376_v0 }
  0x35   :  { %1269 = vset.pattern.permute.xlu1 %v1376_v0  ;;  %87 = vperm.xlu0 %1268, %v1440_v4  }
  0x36   :  { %91 = vperm.xlu1 %1269, %v1442_v5  }
  0x39   :  { %1271 = vset.pattern.permute.xlu0 %v1378_v6 }
  0x3a   :  { %1270 = vset.pattern.permute.xlu1 %v1378_v6  ;;  %117 = vperm.xlu0 %1271, %v1436_v3  }
  0x3b   :  { %113 = vperm.xlu1 %1270, %v1432_v2  }
  0x3e   :  { %1272 = vset.pattern.permute.xlu0 %v1377_v1 }
  0x3f   :  { %121 = vperm.xlu1 %1270, %v1440_v4   ;;  %66 = vperm.xlu0 %1272, %v1450_v7  }
  0x43   :  { %125 = vperm.xlu1 %1270, %v1442_v5   ;;  %1275 = vset.pattern.permute.xlu0 %v1382_v10 }
  0x44   :  { %168 = vperm.xlu0 %1275, %v1432_v2  }
  0x47   :  { %1273 = vset.pattern.permute.xlu1 %v1376_v0 }
  0x48   :  { %95 = vperm.xlu1 %1273, %v1450_v7   ;;  %180 = vperm.xlu0 %1275, %v1442_v5  }
  0x4c   :  { %1274 = vset.pattern.permute.xlu1 %v1378_v6  ;;  %1277 = vset.pattern.permute.xlu0 %v1383_v15 }
  0x4d   :  { %129 = vperm.xlu1 %1274, %v1450_v7   ;;  %899 = vperm.xlu0 %1277, %v1432_v2  }
  0x51   :  { %1276 = vset.pattern.permute.xlu1 %v1382_v10  ;;  %911 = vperm.xlu0 %1277, %v1442_v5  }
  0x52   :  { %172 = vperm.xlu1 %1276, %v1436_v3  }
  0x55   :  { %1279 = vset.pattern.permute.xlu0 %v1384_v25 }
  0x56   :  { %176 = vperm.xlu1 %1276, %v1440_v4   ;;  %934 = vperm.xlu0 %1279, %v1432_v2  }
  0x5a   :  { %184 = vperm.xlu1 %1276, %v1450_v7  }
  0x5e   :  { %1278 = vset.pattern.permute.xlu1 %v1383_v15 }
  0x5f   :  { %903 = vperm.xlu1 %1278, %v1436_v3  }
  0x63   :  { %907 = vperm.xlu1 %1278, %v1440_v4  }
  0x67   :  { %915 = vperm.xlu1 %1278, %v1450_v7  }
  0xa7   :  { %v80_v12 = vpop.permute.xlu1 %79  ;;  %v47_v13 = vpop.permute.xlu0 %46 }
  0xa8   :  { %v102_v29 = vmul.f32 %v101_v23, %v80_v12  ;;  %v73_v30 = vmul.f32 %v72_v24, %v47_v13  ;;  %v188_v12 = vsel %vm187_vm1, %v1432_v2, 0 }
  0xa9   :  { %v1476_v20 = vand.u32 4294901760, %v188_v12 }
  0xaa   :  { %v107_v35 = vadd.f32 %v102_v29, %v73_v30 }
  0xab   :  { %v84_v16 = vpop.permute.xlu1 %83  ;;  %v52_v17 = vpop.permute.xlu0 %51 }
  0xac   :  { %v103_v26 = vmul.f32 %v101_v23, %v84_v16  ;;  %v74_v27 = vmul.f32 %v72_v24, %v52_v17 }
  0xae   :  { %v108_v32 = vadd.f32 %v103_v26, %v74_v27  ;;  %v1483_v27 = vsub.f32 %v188_v12, %v1476_v20 }
  0xaf   :  { %v57_v21 = vpop.permute.xlu0 %56 }
  0xb0   :  { %v62_v22 = vpop.permute.xlu1 %61  ;;  %v75_v38 = vmul.f32 %v72_v24, %v57_v21 }
  0xb1   :  { %v76_v46 = vmul.f32 %v72_v24, %v62_v22 }
  0xb4   :  { %v88_v28 = vpop.permute.xlu0 %87 }
  0xb5   :  { %v92_v31 = vpop.permute.xlu1 %91  ;;  %v104_v33 = vmul.f32 %v101_v23, %v88_v28 }
  0xb6   :  { %v105_v41 = vmul.f32 %v101_v23, %v92_v31 }
  0xb7   :  { %v109_v43 = vadd.f32 %v104_v33, %v75_v38 }
  0xb8   :  { %v110_v50 = vadd.f32 %v105_v41, %v76_v46 }
  0xb9   :  { %v118_v34 = vpop.permute.xlu0 %117 }
  0xba   :  { %v133_v36 = vadd.f32 %v118_v34, %v108_v32  ;;  %v114_v37 = vpop.permute.xlu1 %113  ;;  %v270_v34 = vand.u32 4294901760, %v1483_v27 }
  0xbb   :  { %v132_v39 = vadd.f32 %v114_v37, %v107_v35 }
  0xbc   :  { %v138_v40 = vmul.f32 %v133_v36, %v133_v36 }
  0xbd   :  { %v137_v42 = vmul.f32 %v132_v39, %v132_v39 }
  0xbe   :  { %v143_v44 = vadd.f32 1.0, %v138_v40  ;;  %v122_v45 = vpop.permute.xlu1 %121  ;;  %v67_v54 = vpop.permute.xlu0 %66  ;;  %v194_v40 = vsel %vm187_vm1, %v1442_v5, 0 }
  0xbf   :  { %v142_v47 = vadd.f32 1.0, %v137_v42  ;;  %v134_v48 = vadd.f32 %v122_v45, %v109_v43  ;;  %v77_v56 = vmul.f32 %v72_v24, %v67_v54  ;;  %v190_v24 = vsel %vm187_vm1, %v1436_v3, 0 }
  0xc0   :  { %1280 = vrcp.f32 %v143_v44  ;;  %v1487_v29 = vand.u32 4294901760, %v190_v24  ;;  %v192_v3 = vsel %vm187_vm1, %v1440_v4, 0  ;;  %v1520_v5 = vand.u32 4294901760, %v194_v40 }
  0xc1   :  { %1282 = vrcp.f32 %v142_v47  ;;  %v139_v49 = vmul.f32 %v134_v48, %v134_v48  ;;  %v1501_v37 = vand.u32 4294901760, %v192_v3 }
  0xc2   :  { %v126_v51 = vpop.permute.xlu1 %125  ;;  %v1499_v36 = vsub.f32 %v190_v24, %v1487_v29 }
  0xc3   :  { %v144_v52 = vadd.f32 1.0, %v139_v49  ;;  %v135_v53 = vadd.f32 %v126_v51, %v110_v50 }
  0xc4   :  { %v280_v46 = vand.u32 4294901760, %v1499_v36 }
  0xc5   :  { %1284 = vrcp.f32 %v144_v52  ;;  %v140_v55 = vmul.f32 %v135_v53, %v135_v53 }
  0xc7   :  { %v145_v57 = vadd.f32 1.0, %v140_v55  ;;  %v96_v58 = vpop.permute.xlu1 %95 }
  0xc8   :  { %v106_v59 = vmul.f32 %v101_v23, %v96_v58  ;;  %v1533_v58 = vsub.f32 %v194_v40, %v1520_v5 }
  0xc9   :  { %1286 = vrcp.f32 %v145_v57 }
  0xca   :  { %v1281_v60 = vpop.eup %1280  ;;  %v111_v61 = vadd.f32 %v106_v59, %v77_v56  ;;  %v281_v56 = vsub.f32 %v1499_v36, %v280_v46 }
  0xcb   :  { %v1283_v62 = vpop.eup %1282  ;;  %v153_v63 = vmul.f32 %v1281_v60, %v143_v44  ;;  %v271_v44 = vsub.f32 %v1483_v27, %v270_v34 }
  0xcc   :  { %v152_v0 = vmul.f32 %v1283_v62, %v142_v47  ;;  %v130_v1 = vpop.permute.xlu1 %129  ;;  %v1518_v47 = vsub.f32 %v192_v3, %v1501_v37 }
  0xcd   :  { %v158_v6 = vsub.f32 2.0, %v153_v63  ;;  %v136_v10 = vadd.f32 %v130_v1, %v111_v61  ;;  %v272_v53 = vand.u32 4294901760, %v271_v44 }
  0xce   :  { %v157_v11 = vsub.f32 2.0, %v152_v0  ;;  %v282_v0 = vand.u32 4294901760, %v281_v56 }
  0xcf   :  { %v1285_v13 = vpop.eup %1284  ;;  %v163_v14 = vmul.f32 %v1281_v60, %v158_v6  ;;  %v141_v15 = vmul.f32 %v136_v10, %v136_v10  ;;  %v300_v10 = vand.u32 4294901760, %v1533_v58 }
  0xd0   :  { %v162_v16 = vmul.f32 %v1283_v62, %v157_v11  ;;  %v154_v17 = vmul.f32 %v1285_v13, %v144_v52  ;;  %v196_v52 = vsel %vm187_vm1, %v1450_v7, 0 }
  0xd1   :  { %v146_v18 = vadd.f32 1.0, %v141_v15  ;;  %v202_v19 = vand.u32 4294901760, %v163_v14  ;;  %v1536_v62 = vand.u32 4294901760, %v196_v52 }
  0xd2   :  { %v159_v21 = vsub.f32 2.0, %v154_v17  ;;  %v199_v22 = vand.u32 4294901760, %v162_v16 }
  0xd3   :  { %v1287_v23 = vpop.eup %1286  ;;  %1288 = vrcp.f32 %v146_v18  ;;  %v1491_v31 = vsub.f32 %v163_v14, %v202_v19  ;;  %v1550_v14 = vsub.f32 %v196_v52, %v1536_v62 }
  0xd4   :  { %v155_v25 = vmul.f32 %v1287_v23, %v145_v57  ;;  %v1480_v26 = vpack.c.bf16 %v202_v19, %v199_v22  ;;  %v164_v2 = vmul.f32 %v1285_v13, %v159_v21  ;;  %v1489_v30 = vsub.f32 %v162_v16, %v199_v22 }
  0xd5   :  { %v328_v39 = vand.u32 4294901760, %v1491_v31  ;;  %v290_v57 = vand.u32 4294901760, %v1518_v47 }
  0xd6   :  { %v160_v28 = vsub.f32 2.0, %v155_v25  ;;  %1167 = vmatpush3.bf16.msra.mxu1 %v1480_v26  ;;  %1185 = vmatpush3.bf16.msra.mxu0 %v1480_v26  ;;  %v205_v33 = vand.u32 4294901760, %v164_v2  ;;  %v321_v38 = vand.u32 4294901760, %v1489_v30  ;;  %v1178_v3 = vpack.c.bf16 %v1491_v31, %v1489_v30 }
  0xd7   :  { %1168 = vmatprep.subr.bf16.mxu1 %v1379_v8  ;;  %1186 = vmatprep.subr.bf16.mxu0 %v1379_v8  ;;  %v329_v49 = vsub.f32 %v1491_v31, %v328_v39  ;;  %v291_v1 = vsub.f32 %v1518_v47, %v290_v57 }
  0xd8   :  { %v165_v32 = vmul.f32 %v1287_v23, %v160_v28  ;;  %v1511_v43 = vsub.f32 %v164_v2, %v205_v33  ;;  %v322_v48 = vsub.f32 %v1489_v30, %v321_v38  ;;  %v1190_v12 = vpack.c.bf16 %v328_v39, %v321_v38  ;;  %v173_v30 = vpop.permute.xlu1 %172 }
  0xd9   :  { %v330_v60 = vand.u32 4294901760, %v329_v49  ;;  %v292_v17 = vand.u32 4294901760, %v291_v1  ;;  %v310_v23 = vand.u32 4294901760, %v1550_v14 }
  0xda   :  { %v208_v35 = vand.u32 4294901760, %v165_v32  ;;  %v335_v54 = vand.u32 4294901760, %v1511_v43  ;;  %v323_v59 = vand.u32 4294901760, %v322_v48 }
  0xdb   :  { %v311_v2 = vsub.f32 %v1550_v14, %v310_v23 }
  0xdc   :  { %v1507_v41 = vpack.c.bf16 %v208_v35, %v205_v33  ;;  %v1509_v4 = vsub.f32 %v165_v32, %v208_v35  ;;  %v336_v7 = vsub.f32 %v1511_v43, %v335_v54  ;;  %v1172_v11 = vpack.c.bf16 %v330_v60, %v323_v59 }
  0xdd   :  { %v1289_v42 = vpop.eup %1288  ;;  %v312_v28 = vand.u32 4294901760, %v311_v2 }
  0xde   :  { %v156_v45 = vmul.f32 %v1289_v42, %v146_v18  ;;  %1170 = vmatpush3.bf16.msra.mxu1 %v1507_v41  ;;  %1188 = vmatpush3.bf16.msra.mxu0 %v1507_v41  ;;  %v342_v50 = vand.u32 4294901760, %v1509_v4  ;;  %v337_v16 = vand.u32 4294901760, %v336_v7  ;;  %v301_v18 = vsub.f32 %v1533_v58, %v300_v10 }
  0xdf   :  { %1023 = vmatprep.subr.mxu1 %v1381_v9  ;;  %1098 = vmatprep.subr.mxu0 %v1381_v9  ;;  %v1181_v32 = vpack.c.bf16 %v1509_v4, %v1511_v43 }
  0xe0   :  { %v161_v51 = vsub.f32 2.0, %v156_v45  ;;  %v343_v61 = vsub.f32 %v1509_v4, %v342_v50  ;;  %v1193_v21 = vpack.c.bf16 %v342_v50, %v335_v54  ;;  %v302_v25 = vand.u32 4294901760, %v301_v18 }
  0xe2   :  { %v166_v55 = vmul.f32 %v1289_v42, %v161_v51  ;;  %v344_v13 = vand.u32 4294901760, %v343_v61 }
  0xe4   :  { %v1538_v63 = vand.u32 4294901760, %v166_v55  ;;  %v1175_v19 = vpack.c.bf16 %v344_v13, %v337_v16 }
  0xe6   :  { %1024 = vmatpush3.msra.mxu1 %v1538_v63  ;;  %1099 = vmatpush3.msra.mxu0 %v1538_v63  ;;  %v1545_v6 = vsub.f32 %v166_v55, %v1538_v63 }
  0xe7   :  { %1026 = vmatmul.mubr.f32.vlgmr.msra.gmra.mrb[0].mxu1 %v272_v53  ;;  %1171 = vmatprep.subr.bf16.mxu1 %v1379_v8 }
  0xe8   :  { %1101 = vmatmul.mubr.f32.vlgmr.msra.gmra.mrb[0].mxu0 %v270_v34  ;;  %1189 = vmatprep.subr.bf16.mxu0 %v1379_v8  ;;  %v349_v15 = vand.u32 4294901760, %v1545_v6 }
  0xe9   :  { %1173 = vmatpush3.bf16.msra.mxu1 %v1172_v11  ;;  %1191 = vmatpush3.bf16.msra.mxu0 %v1190_v12 }
  0xea   :  { %1028 = vmatprep.mubr.msk.f32.mxu1 %vm1380_vm0, %v1381_v9  ;;  %1103 = vmatprep.mubr.msk.f32.mxu0 %vm1380_vm0, %v1381_v9  ;;  %v350_v22 = vsub.f32 %v1545_v6, %v349_v15 }
  0xeb   :  { %1029 = vmatmul.mubr.f32.gmra.mrb[2].mxu1 %v282_v0  ;;  %1174 = vmatprep.subr.bf16.mxu1 %v1379_v8 }
  0xec   :  { %1104 = vmatmul.mubr.f32.gmra.mrb[2].mxu0 %v280_v46  ;;  %1192 = vmatprep.subr.bf16.mxu0 %v1379_v8  ;;  %v351_v24 = vand.u32 4294901760, %v350_v22 }
  0xed   :  { %1176 = vmatpush3.bf16.msra.mxu1 %v1175_v19  ;;  %1194 = vmatpush3.bf16.msra.mxu0 %v1193_v21 }
  0xee   :  { %1031 = vmatprep.mubr.msk.f32.mxu1 %vm1380_vm0, %v1381_v9  ;;  %1106 = vmatprep.mubr.msk.f32.mxu0 %vm1380_vm0, %v1381_v9 }
  0xef   :  { %1032 = vmatmul.mubr.f32.gmra.mrb[4].mxu1 %v292_v17  ;;  %1048 = vmatprep.subr.mxu1 %v1381_v9 }
  0xf0   :  { %1107 = vmatmul.mubr.f32.gmra.mrb[4].mxu0 %v290_v57  ;;  %1123 = vmatprep.subr.mxu0 %v1381_v9 }
  0xf1   :  { %1049 = vmatpush3.msra.mxu1 %v351_v24  ;;  %1124 = vmatpush3.msra.mxu0 %v349_v15 }
  0xf2   :  { %1034 = vmatprep.mubr.msk.f32.mxu1 %vm1380_vm0, %v1381_v9  ;;  %1109 = vmatprep.mubr.msk.f32.mxu0 %vm1380_vm0, %v1381_v9 }
  0xf3   :  { %1035 = vmatmul.mubr.f32.gmra.mrb[6].mxu1 %v302_v25  ;;  %1177 = vmatprep.subr.bf16.mxu1 %v1379_v8 }
  0xf4   :  { %1110 = vmatmul.mubr.f32.gmra.mrb[6].mxu0 %v300_v10  ;;  %1037 = vmatprep.mubr.msk.f32.mxu1 %vm1380_vm0, %v1381_v9 }
  0xf5   :  { %1112 = vmatprep.mubr.msk.f32.mxu0 %vm1380_vm0, %v1381_v9  ;;  %1195 = vmatprep.subr.bf16.mxu0 %v1379_v8 }
  0xf7   :  { %1038 = vmatmul.mubr.f32.gmra.mrb[8].mxu1 %v312_v28 }
  0xf8   :  { %1113 = vmatmul.mubr.f32.gmra.mrb[8].mxu0 %v310_v23  ;;  %1050 = vmatprep.mubr.msk.f32.mxu1 %vm1380_vm0, %v1381_v9 }
  0xf9   :  { %1125 = vmatprep.mubr.msk.f32.mxu0 %vm1380_vm0, %v1381_v9 }
  0xfb   :  { %1051 = vmatmul.mubr.f32.vlgmr.msra.gmra.mrb[0].mxu1 %v1476_v20 }
  0xfc   :  { %1179 = vmatpush3.bf16.msra.mxu1 %v1178_v3  ;;  %1126 = vmatmul.mubr.f32.vlgmr.msra.gmra.mrb[0].mxu0 %v1476_v20 }
  0xfd   :  { %1197 = vmatpush3.bf16.msra.mxu0 %v1480_v26  ;;  %1053 = vmatprep.mubr.msk.f32.mxu1 %vm1380_vm0, %v1381_v9 }
  0xfe   :  { %1180 = vmatprep.subr.bf16.mxu1 %v1379_v8  ;;  %1128 = vmatprep.mubr.msk.f32.mxu0 %vm1380_vm0, %v1381_v9 }
  0xff   :  { %1198 = vmatprep.subr.bf16.mxu0 %v1379_v8  ;;  %1054 = vmatmul.mubr.f32.gmra.mrb[2].mxu1 %v1487_v29  ;;  %v169_v8 = vpop.permute.xlu0 %168 }
 0x100   :  { %1182 = vmatpush3.bf16.msra.mxu1 %v1181_v32  ;;  %1129 = vmatmul.mubr.f32.gmra.mrb[2].mxu0 %v1487_v29 }
 0x101   :  { %1200 = vmatpush3.bf16.msra.mxu0 %v1507_v41  ;;  %1056 = vmatprep.mubr.msk.f32.mxu1 %vm1380_vm0, %v1381_v9  ;;  %v177_v41 = vpop.permute.xlu1 %176 }
 0x102   :  { %1073 = vmatprep.subr.mxu1 %v1381_v9  ;;  %1131 = vmatprep.mubr.msk.f32.mxu0 %vm1380_vm0, %v1381_v9 }
 0x103   :  { %1148 = vmatprep.subr.mxu0 %v1381_v9  ;;  %1057 = vmatmul.mubr.f32.gmra.mrb[4].mxu1 %v1501_v37  ;;  %v181_v48 = vpop.permute.xlu0 %180 }
 0x104   :  { %1074 = vmatpush3.msra.mxu1 %v1545_v6  ;;  %1132 = vmatmul.mubr.f32.gmra.mrb[4].mxu0 %v1501_v37 }
 0x105   :  { %1149 = vmatpush3.msra.mxu0 %v1538_v63  ;;  %1059 = vmatprep.mubr.msk.f32.mxu1 %vm1380_vm0, %v1381_v9  ;;  %v185_v57 = vpop.permute.xlu1 %184 }
 0x106   :  { %1134 = vmatprep.mubr.msk.f32.mxu0 %vm1380_vm0, %v1381_v9 }
 0x107   :  { %1060 = vmatmul.mubr.f32.gmra.mrb[6].mxu1 %v1520_v5  ;;  %v900_v18 = vpop.permute.xlu0 %899 }
 0x108   :  { %1135 = vmatmul.mubr.f32.gmra.mrb[6].mxu0 %v1520_v5  ;;  %1062 = vmatprep.mubr.msk.f32.mxu1 %vm1380_vm0, %v1381_v9 }
 0x109   :  { %1137 = vmatprep.mubr.msk.f32.mxu0 %vm1380_vm0, %v1381_v9  ;;  %v904_v19 = vpop.permute.xlu1 %903 }
 0x10b   :  { %1063 = vmatmul.mubr.f32.gmra.mrb[8].mxu1 %v1536_v62 }
 0x10c   :  { %1138 = vmatmul.mubr.f32.gmra.mrb[8].mxu0 %v1536_v62  ;;  %1075 = vmatprep.mubr.msk.f32.mxu1 %vm1380_vm0, %v1381_v9 }
 0x10d   :  { %1150 = vmatprep.mubr.msk.f32.mxu0 %vm1380_vm0, %v1381_v9 }
 0x10f   :  { %1076 = vmatmul.mubr.f32.vlgmr.msra.gmra.mrb[0].mxu1 %v1483_v27 }
 0x110   :  { %1151 = vmatmul.mubr.f32.vlgmr.msra.gmra.mrb[0].mxu0 %v1476_v20  ;;  %1078 = vmatprep.mubr.msk.f32.mxu1 %vm1380_vm0, %v1381_v9 }
 0x111   :  { %1153 = vmatprep.mubr.msk.f32.mxu0 %vm1380_vm0, %v1381_v9 }
 0x113   :  { %1079 = vmatmul.mubr.f32.gmra.mrb[2].mxu1 %v1499_v36 }
 0x114   :  { %1154 = vmatmul.mubr.f32.gmra.mrb[2].mxu0 %v1487_v29  ;;  %1081 = vmatprep.mubr.msk.f32.mxu1 %vm1380_vm0, %v1381_v9 }
 0x115   :  { %1156 = vmatprep.mubr.msk.f32.mxu0 %vm1380_vm0, %v1381_v9 }
 0x117   :  { %1082 = vmatmul.mubr.f32.gmra.mrb[4].mxu1 %v1518_v47 }
 0x118   :  { %1157 = vmatmul.mubr.f32.gmra.mrb[4].mxu0 %v1501_v37  ;;  %1084 = vmatprep.mubr.msk.f32.mxu1 %vm1380_vm0, %v1381_v9 }
 0x119   :  { %1159 = vmatprep.mubr.msk.f32.mxu0 %vm1380_vm0, %v1381_v9 }
 0x11b   :  { %1085 = vmatmul.mubr.f32.gmra.mrb[6].mxu1 %v1533_v58 }
 0x11c   :  { %1160 = vmatmul.mubr.f32.gmra.mrb[6].mxu0 %v1520_v5  ;;  %1087 = vmatprep.mubr.msk.f32.mxu1 %vm1380_vm0, %v1381_v9 }
 0x11d   :  { %1162 = vmatprep.mubr.msk.f32.mxu0 %vm1380_vm0, %v1381_v9 }
 0x11f   :  { %1088 = vmatmul.mubr.f32.gmra.mrb[8].mxu1 %v1550_v14 }
 0x120   :  { %1163 = vmatmul.mubr.f32.gmra.mrb[8].mxu0 %v1536_v62 }
 0x1e2   :  { %v516_v20 = vpop.f32.mrb[0].mxu1 }
 0x1e3   :  { %v1201_v26 = vadd.f32 %v516_v20, %v169_v8  ;;  %v840_v27 = vpop.f32.mrb[0].mxu0  ;;  %v1077_v29 = vpop.f32.mrb[1].mxu1 }
 0x1e4   :  { %v1152_v31 = vpop.f32.mrb[1].mxu0  ;;  %v908_v8 = vpop.permute.xlu1 %907 }
 0x1e5   :  { %v1202_v33 = vadd.f32 %v1201_v26, %v840_v27 }
 0x1e6   :  { %v523_v34 = vpop.f32.mrb[2].mxu1 }
 0x1e7   :  { %v868_v35 = vmul.f32 %v1202_v33, %v1202_v33  ;;  %v1203_v36 = vadd.f32 %v523_v34, %v173_v30  ;;  %v846_v37 = vpop.f32.mrb[2].mxu0  ;;  %v1080_v38 = vpop.f32.mrb[3].mxu1 }
 0x1e8   :  { %v1155_v39 = vpop.f32.mrb[3].mxu0  ;;  %v912_v33 = vpop.permute.xlu0 %911 }
 0x1e9   :  { %v873_v40 = vadd.f32 1.0, %v868_v35  ;;  %v1204_v9 = vadd.f32 %v1203_v36, %v846_v37  ;;  %v916_v38 = vpop.permute.xlu1 %915 }
 0x1ea   :  { %v530_v4 = vpop.f32.mrb[4].mxu1 }
 0x1eb   :  { %1290 = vrcp.f32 %v873_v40  ;;  %v869_v42 = vmul.f32 %v1204_v9, %v1204_v9  ;;  %v1205_v43 = vadd.f32 %v530_v4, %v177_v41  ;;  %v852_v44 = vpop.f32.mrb[4].mxu0  ;;  %v1083_v45 = vpop.f32.mrb[5].mxu1 }
 0x1ec   :  { %v1158_v46 = vpop.f32.mrb[5].mxu0 }
 0x1ed   :  { %v874_v47 = vadd.f32 1.0, %v869_v42  ;;  %v1206_v5 = vadd.f32 %v1205_v43, %v852_v44  ;;  %v935_v44 = vpop.permute.xlu0 %934 }
 0x1ee   :  { %v537_v49 = vpop.f32.mrb[6].mxu1 }
 0x1ef   :  { %1292 = vrcp.f32 %v874_v47  ;;  %v870_v50 = vmul.f32 %v1206_v5, %v1206_v5  ;;  %v1207_v51 = vadd.f32 %v537_v49, %v181_v48  ;;  %v858_v52 = vpop.f32.mrb[6].mxu0  ;;  %v1086_v53 = vpop.f32.mrb[7].mxu1 }
 0x1f0   :  { %v1161_v54 = vpop.f32.mrb[7].mxu0 }
 0x1f1   :  { %v875_v55 = vadd.f32 1.0, %v870_v50  ;;  %v1208_v56 = vadd.f32 %v1207_v51, %v858_v52 }
 0x1f2   :  { %v544_v58 = vpop.f32.mrb[8].mxu1 }
 0x1f3   :  { %1294 = vrcp.f32 %v875_v55  ;;  %v871_v59 = vmul.f32 %v1208_v56, %v1208_v56  ;;  %v1209_v60 = vadd.f32 %v544_v58, %v185_v57  ;;  %v864_v61 = vpop.f32.mrb[8].mxu0  ;;  %v1089_v62 = vpop.f32.mrb[9].mxu1 }
 0x1f4   :  { %v1164_v63 = vpop.f32.mrb[9].mxu0 }
 0x1f5   :  { %v1291_v7 = vpop.eup %1290  ;;  %v876_v0 = vadd.f32 1.0, %v871_v59  ;;  %v1210_v1 = vadd.f32 %v1209_v60, %v864_v61 }
 0x1f6   :  { %v883_v6 = vmul.f32 %v1291_v7, %v873_v40 }
 0x1f7   :  { %1296 = vrcp.f32 %v876_v0  ;;  %v872_v10 = vmul.f32 %v1210_v1, %v1210_v1 }
 0x1f8   :  { %v888_v11 = vsub.f32 2.0, %v883_v6 }
 0x1f9   :  { %v1293_v12 = vpop.eup %1292  ;;  %v877_v13 = vadd.f32 1.0, %v872_v10 }
 0x1fa   :  { %v884_v14 = vmul.f32 %v1293_v12, %v874_v47  ;;  %v893_v16 = vmul.f32 %v1291_v7, %v888_v11 }
 0x1fb   :  { %1298 = vrcp.f32 %v877_v13 }
 0x1fc   :  { %v889_v15 = vsub.f32 2.0, %v884_v14  ;;  %v918_v24 = vmul.f32 %v900_v18, %v893_v16 }
 0x1fd   :  { %v1295_v17 = vpop.eup %1294 }
 0x1fe   :  { %v885_v21 = vmul.f32 %v1295_v17, %v875_v55  ;;  %v894_v22 = vmul.f32 %v1293_v12, %v889_v15 }
 0x200   :  { %v890_v23 = vsub.f32 2.0, %v885_v21  ;;  %v919_v25 = vmul.f32 %v904_v19, %v894_v22 }
 0x201   :  { %v1297_v2 = vpop.eup %1296 }
 0x202   :  { %v886_v28 = vmul.f32 %v1297_v2, %v876_v0  ;;  %v923_v3 = vadd.f32 %v919_v25, %v918_v24  ;;  %v895_v32 = vmul.f32 %v1295_v17, %v890_v23 }
 0x204   :  { %v891_v20 = vsub.f32 2.0, %v886_v28  ;;  %v920_v26 = vmul.f32 %v908_v8, %v895_v32 }
 0x205   :  { %v1299_v27 = vpop.eup %1298 }
 0x206   :  { %v887_v29 = vmul.f32 %v1299_v27, %v877_v13  ;;  %v924_v30 = vadd.f32 %v923_v3, %v920_v26  ;;  %v896_v31 = vmul.f32 %v1297_v2, %v891_v20 }
 0x208   :  { %v892_v34 = vsub.f32 2.0, %v887_v29  ;;  %v921_v35 = vmul.f32 %v912_v33, %v896_v31 }
 0x20a   :  { %v897_v36 = vmul.f32 %v1299_v27, %v892_v34  ;;  %v925_v37 = vadd.f32 %v924_v30, %v921_v35 }
 0x20c   :  { %v922_v39 = vmul.f32 %v916_v38, %v897_v36 }
 0x20e   :  { %v926_v40 = vadd.f32 %v925_v37, %v922_v39 }
 0x210   :  { %v927_v9 = vrot.slane %v926_v40, 4 }
 0x212   :  { %v928_v41 = vadd.f32 %v927_v9, %v926_v40 }
 0x214   :  { %v929_v4 = vrot.slane %v928_v41, 2 }
 0x216   :  { %v930_v42 = vadd.f32 %v929_v4, %v928_v41 }
 0x218   :  { %v931_v43 = vrot.slane %v930_v42, 1 }
 0x21a   :  { %v932_v45 = vadd.f32 %v931_v43, %v930_v42 }
 0x21c   :  { %v937_v46 = vadd.f32 %v935_v44, %v932_v45 }
 0x21e   :  { %938 = vst [vmem:[#allocation7] sm:$0x1] %v937_v46 }
 0x21f   :  { %1355 = shalt.err (!%p1352_p6)
}
 0x220   :  { %s1356_s11 = scalar_lea.hbm %s1666_s2, 16 }
 0x221   :  { %p1357_p7 = scmp.ne.s32.totalorder %s1666_s2, %s1356_s11  ;;  %p1360_p8 = scmp.lt.u32.totalorder %s1356_s11, %s1666_s2 }
 0x223   :  { %p1362_p9 = pnand %p1360_p8, %p1357_p7 }
 0x225   :  { %1365 = shalt.err (!%p1362_p9)
}
 0x226   :  { %948 = dma.vmem_to_hbm [thread:$0]  %s946_s6, 16, %s1666_s2, [#allocation4]  }
 0x227   :  { %1370 = dma.done.wait [#allocation4], 16  }
 0x228   :  { %1371 = vsyncadd [#allocation4], 4294967280 }
 0x229   :  { %952 = vsyncpa [#allocation3], 1 }
 0x22a   :  { %953 = vsyncpa [#allocation6], 1 }
 0x22b   :  { %954 = vsyncpa [#allocation4], 1 }

</bundles_post_ra>
